<compile_context>
chip_gen: v6e
topology: v6e:2x2x1
jax: 0.10.0
libtpu: 0.0.40
codegen_flags: <defaults>
</compile_context>

<pallas_src>
import functools

import jax
import jax.numpy as jnp
from jax import lax
from jax.experimental import pallas as pl
from jax.experimental.pallas import tpu as pltpu

_LANES = 128
_CHUNK = 512          # in-kernel lane chunk: bounds live vregs per iteration
_MAX_TILE = 8192      # per-grid-step tile of the num_train axis


def _round_up(x, m):
    return ((x + m - 1) // m) * m


def _adsh_square_kernel(u_ref, vt_ref, s_ref, out_ref, *, code_length, chunk):
    """One num_train tile of sum((u @ V.T - c*S)^2), folded to (batch, 128)."""
    u = u_ref[...].astype(jnp.float32)          # (batch, cl) -- tiny, resident
    c = jnp.float32(code_length)
    tile_n = s_ref.shape[1]
    n_chunks = tile_n // chunk
    folds = chunk // _LANES

    def body(k, acc):
        start = pl.multiple_of(k * chunk, chunk)
        # bf16 streams upcast to f32 on the VPU (free filler: kernel is
        # HBM-bandwidth bound).
        v_c = vt_ref[:, pl.ds(start, chunk)].astype(jnp.float32)   # (cl, chunk)
        s_c = s_ref[:, pl.ds(start, chunk)].astype(jnp.float32)    # (b,  chunk)
        uv = lax.dot_general(                                      # MXU
            u, v_c, dimension_numbers=(((1,), (0,)), ((), ())),
            preferred_element_type=jnp.float32)                    # (b, chunk)
        resid = uv - c * s_c
        sq = resid * resid
        # Lane-resident fold: chunk -> 128 lanes with pure VPU adds; the one
        # expensive cross-lane reduce happens outside the kernel.
        part = sq[:, 0:_LANES]
        for f in range(1, folds):
            part = part + sq[:, f * _LANES:(f + 1) * _LANES]
        return acc + part

    out_ref[...] = lax.fori_loop(
        0, n_chunks, body, jnp.zeros(out_ref.shape, jnp.float32), unroll=True)


def adsh_loss(u, V, S, B, *, gamma, code_length, num_train, tile_n=None):
    batch_size, cl = u.shape
    nt = V.shape[0]
    assert nt == num_train and V.shape[1] == code_length and cl == code_length
    assert S.shape == (batch_size, num_train)
    assert B.shape == (batch_size, code_length)

    u = u.astype(jnp.float32)
    B = B.astype(jnp.float32)

    # ---- tile / grid selection --------------------------------------------
    if tile_n is None:
        # >= 4 grid steps when the problem is big enough (hides DMA behind
        # the pipeline) and an even block count (v7x 2-TC "parallel" split);
        # tiles capped at _MAX_TILE, lane-aligned, divisible by the chunk.
        nb = max(2, pl.cdiv(num_train, _MAX_TILE))
        nb = _round_up(nb, 2)
        if nb < 4 and num_train >= 4 * _CHUNK:
            nb = 4
        tile_n = _round_up(pl.cdiv(num_train, nb), _LANES)
        if tile_n > _CHUNK:
            tile_n = _round_up(tile_n, _CHUNK)
        tile_n = min(tile_n, _round_up(num_train, _LANES))
    assert tile_n % _LANES == 0, "tile_n must be a multiple of 128"
    chunk = next(c for c in (_CHUNK, 256, _LANES) if tile_n % c == 0)

    num_blocks = pl.cdiv(num_train, tile_n)
    if num_blocks > 1 and num_blocks % 2:
        num_blocks += 1                    # even grid for the v7x 2-TC split
    n_pad = num_blocks * tile_n
    pad = n_pad - num_train

    # ---- stream layout: bf16 (exact for +/-1 codes), V pre-transposed ------
    # Zero-padding is exact: padded residual = u @ 0 - c*0 = 0.
    Vt = jnp.pad(V.astype(jnp.bfloat16).T, ((0, 0), (0, pad)))   # (cl, n_pad)
    Sp = jnp.pad(S.astype(jnp.bfloat16), ((0, 0), (0, pad)))     # (b,  n_pad)

    kernel = functools.partial(
        _adsh_square_kernel, code_length=code_length, chunk=chunk)

    # Advisory cost: HBM-bandwidth bound on the bf16 V + S streams.
    flops = 2 * batch_size * code_length * n_pad
    bytes_accessed = (2 * (Vt.size + Sp.size) + 4 * u.size
                      + 4 * num_blocks * batch_size * _LANES)

    partials = pl.pallas_call(
        kernel,
        out_shape=jax.ShapeDtypeStruct(
            (num_blocks, batch_size, _LANES), jnp.float32),
        grid_spec=pltpu.PrefetchScalarGridSpec(
            num_scalar_prefetch=0,
            grid=(num_blocks,),
            in_specs=[
                pl.BlockSpec((batch_size, code_length), lambda j: (0, 0)),  # u
                pl.BlockSpec((code_length, tile_n), lambda j: (0, j)),      # V^T
                pl.BlockSpec((batch_size, tile_n), lambda j: (0, j)),       # S
            ],
            out_specs=pl.BlockSpec(
                (None, batch_size, _LANES), lambda j: (j, 0, 0)),
        ),
        compiler_params=pltpu.CompilerParams(
            dimension_semantics=("parallel",)),
        cost_estimate=pl.CostEstimate(
            flops=flops, transcendentals=0, bytes_accessed=bytes_accessed),
    )(u, Vt, Sp)

    # Tiny epilogue in plain JAX: final reduce, quantization term, normalize.
    square_sum = jnp.sum(partials)
    quant = jnp.float32(gamma) * jnp.sum((B - u) ** 2)
    return (square_sum + quant) / jnp.float32(num_train * batch_size)


def adsh_loss_ref(u, V, S, B, *, gamma, code_length, num_train):
    batch_size = u.shape[0]
    square_loss = (u @ V.T - code_length * S) ** 2
    quantization_loss = gamma * (B - u) ** 2
    return (square_loss.sum() + quantization_loss.sum()) / (num_train * batch_size)


if __name__ == "__main__":
    # Module hyperparameters (deterministic, synthetic, small).
    gamma = 200.0
    code_length = 16
    num_train = 6000          # exercises multi-block grid, chunking & padding
    batch = 8

    key = jax.random.PRNGKey(0)
    ku, kv, ks, kb = jax.random.split(key, 4)

    u = jax.random.normal(ku, (batch, code_length), dtype=jnp.float32)
    V = jnp.sign(jax.random.normal(kv, (num_train, code_length),
                                   dtype=jnp.float32))
    S = jnp.where(jax.random.uniform(ks, (batch, num_train)) > 0.5,
                  jnp.float32(1.0), jnp.float32(-1.0))
    B = jnp.sign(jax.random.normal(kb, (batch, code_length),
                                   dtype=jnp.float32))

    loss = adsh_loss(u, V, S, B, gamma=gamma, code_length=code_length,
                     num_train=num_train)
    loss = jax.block_until_ready(loss)

    ref = adsh_loss_ref(u, V, S, B, gamma=gamma, code_length=code_length,
                        num_train=num_train)

    assert jnp.allclose(loss, ref, rtol=1e-4, atol=1e-4), (loss, ref)
    print("KERNEL_OK")
</pallas_src>

<mosaic_0001>
module attributes {stable_mosaic.version = 11 : i64} {
  func.func @_adsh_square_kernel(%arg0: i32, %arg1: memref<8x16xf32, #tpu.memory_space<vmem>>, %arg2: memref<16x1536xbf16, #tpu.memory_space<vmem>>, %arg3: memref<8x1536xbf16, #tpu.memory_space<vmem>>, %arg4: memref<1x8x128xf32, #tpu.memory_space<vmem>>) attributes {dimension_semantics = [#tpu.dimension_semantics<parallel>], iteration_bounds = array<i64: 4>, scalar_prefetch = 0 : i64, scratch_operands = 0 : i64, tpu.core_type = #tpu.core_type<tc>, window_params = [{pipeline_mode = #tpu.pipeline_mode<synchronous>, transform_indices = @transform_0, window_bounds = array<i64: 8, 16>}, {transform_indices = @transform_1, window_bounds = array<i64: 16, 1536>}, {transform_indices = @transform_2, window_bounds = array<i64: 8, 1536>}, {transform_indices = @transform_3, window_bounds = array<i64: 1, 8, 128>}]} {
    %c0 = arith.constant 0 : index
    %c0_0 = arith.constant 0 : index
    %0 = vector.load %arg1[%c0, %c0_0] : memref<8x16xf32, #tpu.memory_space<vmem>>, vector<8x16xf32>
    %cst = arith.constant 0.000000e+00 : f32
    %1 = vector.broadcast %cst : f32 to vector<8x128xf32>
    %cst_1 = arith.constant 1.600000e+01 : f32
    %c0_i32 = arith.constant 0 : i32
    %c512_i32 = arith.constant 512 : i32
    %2 = arith.muli %c0_i32, %c512_i32 : i32
    %3 = tpu.assume_multiple %2, 512 : i32
    %c0_2 = arith.constant 0 : index
    %4 = arith.index_cast %3 : i32 to index
    %5 = vector.load %arg2[%c0_2, %4] : memref<16x1536xbf16, #tpu.memory_space<vmem>>, vector<16x512xbf16>
    %6 = arith.extf %5 : vector<16x512xbf16> to vector<16x512xf32>
    %c0_3 = arith.constant 0 : index
    %7 = arith.index_cast %3 : i32 to index
    %8 = vector.load %arg3[%c0_3, %7] : memref<8x1536xbf16, #tpu.memory_space<vmem>>, vector<8x512xbf16>
    %9 = arith.extf %8 : vector<8x512xbf16> to vector<8x512xf32>
    %cst_4 = arith.constant dense<0.000000e+00> : vector<8x512xf32>
    %10 = tpu.matmul %0, %6, %cst_4 {dimension_numbers = #tpu.dot_dimension_numbers<[1], [0], [0], [1], [0, 0, 1, 1], [], []>} : vector<8x16xf32>, vector<16x512xf32>, vector<8x512xf32> -> vector<8x512xf32>
    %11 = vector.broadcast %cst_1 : f32 to vector<8x512xf32>
    %12 = arith.mulf %11, %9 : vector<8x512xf32>
    %13 = arith.subf %10, %12 : vector<8x512xf32>
    %14 = arith.mulf %13, %13 : vector<8x512xf32>
    %15 = vector.extract_strided_slice %14 {offsets = [0, 0], sizes = [8, 128], strides = [1, 1]} : vector<8x512xf32> to vector<8x128xf32>
    %16 = vector.extract_strided_slice %14 {offsets = [0, 128], sizes = [8, 128], strides = [1, 1]} : vector<8x512xf32> to vector<8x128xf32>
    %17 = arith.addf %15, %16 : vector<8x128xf32>
    %18 = vector.extract_strided_slice %14 {offsets = [0, 256], sizes = [8, 128], strides = [1, 1]} : vector<8x512xf32> to vector<8x128xf32>
    %19 = arith.addf %17, %18 : vector<8x128xf32>
    %20 = vector.extract_strided_slice %14 {offsets = [0, 384], sizes = [8, 128], strides = [1, 1]} : vector<8x512xf32> to vector<8x128xf32>
    %21 = arith.addf %19, %20 : vector<8x128xf32>
    %22 = arith.addf %1, %21 : vector<8x128xf32>
    %c1_i32 = arith.constant 1 : i32
    %c512_i32_5 = arith.constant 512 : i32
    %23 = arith.muli %c1_i32, %c512_i32_5 : i32
    %24 = tpu.assume_multiple %23, 512 : i32
    %c0_6 = arith.constant 0 : index
    %25 = arith.index_cast %24 : i32 to index
    %26 = vector.load %arg2[%c0_6, %25] : memref<16x1536xbf16, #tpu.memory_space<vmem>>, vector<16x512xbf16>
    %27 = arith.extf %26 : vector<16x512xbf16> to vector<16x512xf32>
    %c0_7 = arith.constant 0 : index
    %28 = arith.index_cast %24 : i32 to index
    %29 = vector.load %arg3[%c0_7, %28] : memref<8x1536xbf16, #tpu.memory_space<vmem>>, vector<8x512xbf16>
    %30 = arith.extf %29 : vector<8x512xbf16> to vector<8x512xf32>
    %cst_8 = arith.constant dense<0.000000e+00> : vector<8x512xf32>
    %31 = tpu.matmul %0, %27, %cst_8 {dimension_numbers = #tpu.dot_dimension_numbers<[1], [0], [0], [1], [0, 0, 1, 1], [], []>} : vector<8x16xf32>, vector<16x512xf32>, vector<8x512xf32> -> vector<8x512xf32>
    %32 = vector.broadcast %cst_1 : f32 to vector<8x512xf32>
    %33 = arith.mulf %32, %30 : vector<8x512xf32>
    %34 = arith.subf %31, %33 : vector<8x512xf32>
    %35 = arith.mulf %34, %34 : vector<8x512xf32>
    %36 = vector.extract_strided_slice %35 {offsets = [0, 0], sizes = [8, 128], strides = [1, 1]} : vector<8x512xf32> to vector<8x128xf32>
    %37 = vector.extract_strided_slice %35 {offsets = [0, 128], sizes = [8, 128], strides = [1, 1]} : vector<8x512xf32> to vector<8x128xf32>
    %38 = arith.addf %36, %37 : vector<8x128xf32>
    %39 = vector.extract_strided_slice %35 {offsets = [0, 256], sizes = [8, 128], strides = [1, 1]} : vector<8x512xf32> to vector<8x128xf32>
    %40 = arith.addf %38, %39 : vector<8x128xf32>
    %41 = vector.extract_strided_slice %35 {offsets = [0, 384], sizes = [8, 128], strides = [1, 1]} : vector<8x512xf32> to vector<8x128xf32>
    %42 = arith.addf %40, %41 : vector<8x128xf32>
    %43 = arith.addf %22, %42 : vector<8x128xf32>
    %c2_i32 = arith.constant 2 : i32
    %c512_i32_9 = arith.constant 512 : i32
    %44 = arith.muli %c2_i32, %c512_i32_9 : i32
    %45 = tpu.assume_multiple %44, 512 : i32
    %c0_10 = arith.constant 0 : index
    %46 = arith.index_cast %45 : i32 to index
    %47 = vector.load %arg2[%c0_10, %46] : memref<16x1536xbf16, #tpu.memory_space<vmem>>, vector<16x512xbf16>
    %48 = arith.extf %47 : vector<16x512xbf16> to vector<16x512xf32>
    %c0_11 = arith.constant 0 : index
    %49 = arith.index_cast %45 : i32 to index
    %50 = vector.load %arg3[%c0_11, %49] : memref<8x1536xbf16, #tpu.memory_space<vmem>>, vector<8x512xbf16>
    %51 = arith.extf %50 : vector<8x512xbf16> to vector<8x512xf32>
    %cst_12 = arith.constant dense<0.000000e+00> : vector<8x512xf32>
    %52 = tpu.matmul %0, %48, %cst_12 {dimension_numbers = #tpu.dot_dimension_numbers<[1], [0], [0], [1], [0, 0, 1, 1], [], []>} : vector<8x16xf32>, vector<16x512xf32>, vector<8x512xf32> -> vector<8x512xf32>
    %53 = vector.broadcast %cst_1 : f32 to vector<8x512xf32>
    %54 = arith.mulf %53, %51 : vector<8x512xf32>
    %55 = arith.subf %52, %54 : vector<8x512xf32>
    %56 = arith.mulf %55, %55 : vector<8x512xf32>
    %57 = vector.extract_strided_slice %56 {offsets = [0, 0], sizes = [8, 128], strides = [1, 1]} : vector<8x512xf32> to vector<8x128xf32>
    %58 = vector.extract_strided_slice %56 {offsets = [0, 128], sizes = [8, 128], strides = [1, 1]} : vector<8x512xf32> to vector<8x128xf32>
    %59 = arith.addf %57, %58 : vector<8x128xf32>
    %60 = vector.extract_strided_slice %56 {offsets = [0, 256], sizes = [8, 128], strides = [1, 1]} : vector<8x512xf32> to vector<8x128xf32>
    %61 = arith.addf %59, %60 : vector<8x128xf32>
    %62 = vector.extract_strided_slice %56 {offsets = [0, 384], sizes = [8, 128], strides = [1, 1]} : vector<8x512xf32> to vector<8x128xf32>
    %63 = arith.addf %61, %62 : vector<8x128xf32>
    %64 = arith.addf %43, %63 : vector<8x128xf32>
    %c3_i32 = arith.constant 3 : i32
    %c0_13 = arith.constant 0 : index
    %c0_14 = arith.constant 0 : index
    %c0_15 = arith.constant 0 : index
    %65 = vector.load %arg4[%c0_13, %c0_14, %c0_15] : memref<1x8x128xf32, #tpu.memory_space<vmem>>, vector<1x8x128xf32>
    %66 = vector.shape_cast %65 : vector<1x8x128xf32> to vector<8x128xf32>
    %67 = vector.shape_cast %64 : vector<8x128xf32> to vector<1x8x128xf32>
    tpu.vector_store %arg4[%c0_13, %c0_14, %c0_15], %67 {strides = array<i32>} : memref<1x8x128xf32, #tpu.memory_space<vmem>>, vector<1x8x128xf32>,
    return
  }
  func.func @transform_0(%arg0: i32) -> (i32, i32) {
    %c0_i32 = arith.constant 0 : i32
    %c0_i32_0 = arith.constant 0 : i32
    %c0_i32_1 = arith.constant 0 : i32
    return %c0_i32, %c0_i32_0 : i32, i32
  }
  func.func @transform_1(%arg0: i32) -> (i32, i32) {
    %c0_i32 = arith.constant 0 : i32
    %c0_i32_0 = arith.constant 0 : i32
    return %c0_i32, %arg0 : i32, i32
  }
  func.func @transform_2(%arg0: i32) -> (i32, i32) {
    %c0_i32 = arith.constant 0 : i32
    %c0_i32_0 = arith.constant 0 : i32
    return %c0_i32, %arg0 : i32, i32
  }
  func.func @transform_3(%arg0: i32) -> (i32, i32, i32) {
    %c0_i32 = arith.constant 0 : i32
    %c0_i32_0 = arith.constant 0 : i32
    %c0_i32_1 = arith.constant 0 : i32
    return %arg0, %c0_i32, %c0_i32_0 : i32, i32, i32
  }
}

</mosaic_0001>

<bundles_post_ra>
// kernel: tpu_custom_call.1
= control target key start
LH: loop header
LB: loop body
LE: loop exit
PB: predicated region body
PF: predicated region fallthrough
CT: control target
= control target key end

     0   :  { %8 = vsyncpa [#allocation3], 0  ;;  %s1414_s0 = inlined_call_operand.hbm [shape: f32[8,16], index: 0, kind: input, shape index: {}]   ;;  %s1415_s1 = inlined_call_operand.hbm [shape: bf16[16,6144], index: 1, kind: input, shape index: {}]   ;;  %s1416_s2 = inlined_call_operand.hbm [shape: bf16[8,6144], index: 2, kind: input, shape index: {}]   ;;  %s1417_s3 = inlined_call_operand.hbm [shape: f32[4,8,128], index: 3, kind: output, shape index: {}]  }
   0x1   :  { %9 = vsyncpa [#allocation6], 0 }
   0x2   :  { %11 = vsyncpa [#allocation6 + $0x1], 0 }
   0x3   :  { %12 = vsyncpa [#allocation4], 0 }
   0x4   :  { %14 = vsyncpa [#allocation4 + $0x1], 0  ;;  %s1176_s12 = smov 0   ;;  %s1178_s13 = smov 0  }
   0x5   :  { %s1180_s14 = smov 0   ;;  %s1182_s15 = smov 0  }
   0x6 LB: > { %s1197_s16 = sadd.s32 1, %s1146_s15   ;;  %s48_s17 = sadd.s32 1, %s1142_s14  ;;  %s1146_s15 = sphi %s1182_s15, %s1438_s15   ;;  %s1142_s14 = sphi %s1180_s14, %s1437_s14   ;;  %s1138_s13 = sphi %s1178_s13, %s1436_s13   ;;  %s1134_s12 = sphi %s1176_s12, %s1435_s12  }
   0x7   : > { %s45_s18 = ssub.s32 %s1146_s15, %s1197_s16  ;;  %p55_p0 = scmp.ne.s32.totalorder %s1142_s14, %s1138_s13 }
   0x8   : > { %p46_p1 = scmp.eq.s32.totalorder %s45_s18, 0  ;;  %p56_p2 = scmp.eq.s32.totalorder %s1146_s15, 0 }
   0x9   : > { %p956_p3 = scmp.lt.s32.totalorder %s1146_s15, 4  ;;  %s148_s20 = sand.u32 1, %s1146_s15  }
   0xa   : > { %s1207_s19 = scalar_select %p46_p1, %s1142_s14, %s48_s17  }
   0xb   : > { %p57_p4 = por %p56_p2, %p55_p0  ;;  %s150_s21 = sand.u32 1, %s1142_s14  }
   0xc   : > { %s926_s22 = smul.u32 96, %s150_s21  ;;  %s1230_s30 = scalar_lea.sflag [#allocation6], %s148_s20 }
   0xd   : > { %p1216_p5 = pnand %p956_p3, %p57_p4  ;;  %s924_s24 = smul.u32 768, %s1146_s15 }
   0xe   : > { %s152_s28 = scalar_lea.vmem [#allocation5], %s926_s22  ;;  %s1001_s7 = scalar_lea.hbm %s1415_s1, 6144 }
   0xf   : > { %s1226_s27 = scalar_lea.hbm %s1415_s1, %s924_s24  ;;  %s159_s29 = sshll.u32 %s152_s28, 4  ;;  %s1228_s29 = int_to_ptr.vmem [resolvable:$true] %s159_s29 }
  0x10   : > { %s996_s4 = scalar_lea.hbm %s1226_s27, 1536  ;;  %p1419_p7 = pneg %p1216_p5 }
  0x11   : > { %p997_p6 = scmp.ne.s32.totalorder %s1226_s27, %s996_s4  ;;  %p1002_p10 = scmp.lt.s32.totalorder %s1226_s27, %s1415_s1 }
  0x12   : > { %p1003_p11 = scmp.lt.s32.totalorder %s1001_s7, %s996_s4 }
  0x13   : > { %p999_p8 = pnand %p1419_p7, %p997_p6 }
  0x14   : > { %p1004_p12 = por %p1003_p11, %p1002_p10 }
  0x15   : > { %p1000_p9 = pneg %p999_p8 }
  0x17   : > { %p1005_p13 = pnand %p1004_p12, %p1000_p9 }
  0x19   : > { %1008 = shalt.err (!%p1005_p13)
}
  0x1a   : > { %s1009_s10 = scalar_lea.vmem %s1228_s29, 1536  ;;  %s1148_s11 = smov [#allocation5]  }
  0x1b   : > { %p1010_p1 = scmp.ne.s32.totalorder %s1228_s29, %s1009_s10  ;;  %s1014_s17 = sshll.u32 %s1148_s11, 4  ;;  %s1015_s17 = int_to_ptr.vmem [resolvable:$false] %s1014_s17 }
  0x1c   : > { %s1016_s18 = scalar_lea.vmem %s1015_s17, 3072  ;;  %p1017_p4 = scmp.lt.s32.totalorder %s1228_s29, %s1015_s17 }
  0x1d   : > { %p1012_p2 = pnand %p1010_p1, %p1419_p7  ;;  %p1018_p6 = scmp.lt.s32.totalorder %s1016_s18, %s1009_s10 }
  0x1f   : > { %p1013_p3 = pneg %p1012_p2  ;;  %p1019_p8 = por %p1018_p6, %p1017_p4 }
  0x21   : > { %p1020_p10 = pnand %p1019_p8, %p1013_p3 }
  0x23   : > { %1023 = shalt.err (!%p1020_p10)
}
  0x24   : > { %s1149_s20 = smov 3072   ;;  %s1150_s22 = smov 768  }
  0x25   : > { %s1151_s25 = smov 48   ;;  %s1258_s26 = sadd.s32 4294967295, %s1146_s15  }
  0x26   : > { %947 = dma.hbm_to_vmem [thread:$0]  (!%p1216_p5), %s1226_s27, 1536, %s1228_s29, %s1230_s30, %s1149_s20, %s1150_s22, %s1151_s25  }
  0x27   : > { %s893_s28 = sadd.s32 4294967294, %s1146_s15   ;;  %p61_p9 = scmp.ne.s32.totalorder %s1138_s13, %s1134_s12 }
  0x28   : > { %p1418_p11 = scmp.eq.s32.totalorder %s1258_s26, 0  ;;  %p111_p12 = scmp.eq.s32.totalorder %s1258_s26, 3 }
  0x29   : > { %p117_p13 = scmp.eq.s32.totalorder %s893_s28, 3  ;;  %p894_p1 = scmp.ge.s32.totalorder %s1146_s15, 1 }
  0x2a   : > { %p1268_p2 = por %p1418_p11, %p61_p9  ;;  %p1275_p3 = por %p111_p12, %p55_p0 }
  0x2b   : > { %p1279_p4 = por %p117_p13, %p61_p9  ;;  %p124_p6 = scmp.lt.s32.totalorder %s1146_s15, 5 }
  0x2c   : > { %s1423_s4 = scalar_select %p1268_p2, 1, 0 }
  0x2d   : > { %s1424_s27 = scalar_select %p1275_p3, 1, 0 }
  0x2e   : > { %s1425_s29 = scalar_select %p1279_p4, 1, 0 }
  0x2f   : > { %p1284_p8 = pnand %p894_p1, %p124_p6  ;;  %s1152_s6 = smov [#allocation2]  }
  0x30   : > { %s137_s7 = sshll.u32 %s1152_s6, 4  ;;  %s927_s8 = smul.u32 48, %s150_s21  ;;  %s138_s7 = int_to_ptr.vmem [resolvable:$true] %s137_s7 }
  0x31   : > { %p940_p10 = pneg %p1284_p8  ;;  %s1303_s20 = scalar_lea.hbm %s1416_s2, %s924_s24 }
  0x32   : > { %s173_s10 = scalar_lea.vmem [#allocation7], %s927_s8  ;;  %s1035_s21 = scalar_lea.vmem %s138_s7, 128 }
  0x33   : > { %p1294_p0 = pnand %p940_p10, %p1418_p11  ;;  %s181_s11 = sshll.u32 %s173_s10, 4  ;;  %s1305_s11 = int_to_ptr.vmem [resolvable:$true] %s181_s11 }
  0x34   : > { %p1036_p12 = scmp.ne.s32.totalorder %s138_s7, %s1035_s21  ;;  %p1043_p6 = scmp.lt.s32.totalorder %s138_s7, %s138_s7 }
  0x35   : > { %p1026_p9 = pneg %p1294_p0  ;;  %p1044_p10 = scmp.lt.s32.totalorder %s1035_s21, %s1035_s21 }
  0x37   : > { %p1038_p13 = pnand %p1036_p12, %p1026_p9  ;;  %p1045_p11 = por %p1044_p10, %p1043_p6 }
  0x39   : > { %p1039_p1 = pneg %p1038_p13 }
  0x3b   : > { %p1046_p7 = pnand %p1045_p11, %p1039_p1 }
  0x3d   : > { %1049 = shalt.err (!%p1046_p7)
}
  0x3e   : > { %943 = dma.hbm_to_vmem [thread:$0]  (!%p1294_p0), %s1414_s0, 128, %s138_s7, [#allocation3]  }
  0x3f   : > { %s1050_s24 = scalar_lea.hbm %s1303_s20, 768  ;;  %p1428_p9 = pneg %p1216_p5 }
  0x40   : > { %p1051_p4 = scmp.ne.s32.totalorder %s1303_s20, %s1050_s24  ;;  %s1055_s8 = scalar_lea.hbm %s1416_s2, 3072 }
  0x41   : > { %p1056_p7 = scmp.lt.s32.totalorder %s1303_s20, %s1416_s2  ;;  %p1057_p11 = scmp.lt.s32.totalorder %s1055_s8, %s1050_s24 }
  0x42   : > { %p1053_p12 = pnand %p1051_p4, %p1428_p9 }
  0x43   : > { %p1058_p1 = por %p1057_p11, %p1056_p7 }
  0x44   : > { %p1054_p13 = pneg %p1053_p12 }
  0x46   : > { %p1059_p6 = pnand %p1058_p1, %p1054_p13 }
  0x48   : > { %1062 = shalt.err (!%p1059_p6)
}
  0x49   : > { %s1063_s7 = scalar_lea.vmem %s1305_s11, 768  ;;  %p1429_p4 = pmov %p1428_p9 }
  0x4a   : > { %p1064_p0 = scmp.ne.s32.totalorder %s1305_s11, %s1063_s7  ;;  %s1153_s17 = smov [#allocation7]  }
  0x4b   : > { %s1068_s18 = sshll.u32 %s1153_s17, 4  ;;  %s1069_s18 = int_to_ptr.vmem [resolvable:$false] %s1068_s18 }
  0x4c   : > { %p1066_p10 = pnand %p1064_p0, %p1429_p4  ;;  %s1070_s21 = scalar_lea.vmem %s1069_s18, 1536 }
  0x4d   : > { %p1071_p12 = scmp.lt.s32.totalorder %s1305_s11, %s1069_s18  ;;  %p1072_p3 = scmp.lt.s32.totalorder %s1070_s21, %s1063_s7 }
  0x4e   : > { %p1067_p9 = pneg %p1066_p10 }
  0x4f   : > { %p1073_p2 = por %p1072_p3, %p1071_p12 }
  0x51   : > { %p1074_p7 = pnand %p1073_p2, %p1067_p9 }
  0x53   : > { %1077 = shalt.err (!%p1074_p7)
}
  0x54   : > { %950 = dma.hbm_to_vmem [thread:$0]  (!%p1216_p5), %s1303_s20, 768, %s1305_s11, %s1230_s30  }
  0x55   : > { %190 = sbr.rel (%p1284_p8) target bundleno = 333 (0x14d), region = 32  ;;  %p1430_p13 = scmp.eq.s32.totalorder (!%p1284_p8), %s1258_s26, 0 }
  0x5a   : > { %1121 = dma.done.wait (%p1430_p13), [#allocation3], 128   ;;  %p1431_p11 = pmov %p1430_p13 }
  0x5b   : > { %s196_s22 = sand.u32 1, %s1258_s26   ;;  %s1345_s25 = sand.u32 1, %s1138_s13  }
  0x5c   : > { %1123 = vsyncadd (%p1431_p11), [#allocation3], 4294967168  ;;  %s928_s23 = smul.u32 96, %s1345_s25  ;;  %s197_s24 = scalar_lea.sflag [#allocation6], %s196_s22 }
  0x5d   : > { %p1432_p5 = scmp.ne.s32.totalorder %s1423_s4, 0 }
  0x5e   : > { %s1348_s28 = scalar_lea.vmem [#allocation5], %s928_s23 }
  0x5f   : > { %1125 = dma.done.wait (%p1432_p5), %s197_s24, 2304  }
  0x60   : > { %1127 = vsyncadd (%p1432_p5), %s197_s24, 4294964992  ;;  %v1154_v0 = vmov 0.0   ;;  %v242_v1 = vld [vmem:[%s1348_s28 + $0x30] sm:$0xff]  ;;  %v240_v2 = vld [vmem:[%s1348_s28] sm:$0xff]  ;;  %vm258_vm0 = vcmask 130048   ;;  %s929_s30 = smul.u32 48, %s1345_s25 }
  0x61   : > { %326 = vmatprep.mubr.f32.mxu0 %v1154_v0  ;;  %397 = vmatprep.mubr.f32.mxu1 %v1154_v0  ;;  %v243_v3 = vld [vmem:[%s1348_s28 + $0x38] sm:$0xff]  ;;  %v249_v4 = vunpack.c.h.bf16 %v242_v1  ;;  %v248_v5 = vunpack.c.l.bf16 %v242_v1  ;;  %v245_v6 = vunpack.c.h.bf16 %v240_v2  ;;  %v906_v7 = vld [vmem:[%s1348_s28 + $0x40] sm:$0xff]  ;;  %v241_v8 = vld [vmem:[%s1348_s28 + $0x8] sm:$0xff]  ;;  %v244_v9 = vunpack.c.l.bf16 %v240_v2  ;;  %s901_s5 = sshll.u32 %s1345_s25, 3  ;;  %s921_s11 = sshll.u32 %s1258_s26, 7 }
  0x62   : > { %v251_v10 = vunpack.c.h.bf16 %v243_v3  ;;  %v250_v11 = vunpack.c.l.bf16 %v243_v3  ;;  %v904_v12 = vld [vmem:[%s1348_s28 + $0x10] sm:$0xff]  ;;  %v430_v13 = vunpack.c.h.bf16 %v906_v7  ;;  %v247_v14 = vunpack.c.h.bf16 %v241_v8  ;;  %v239_v15 = vld [vmem:[#allocation2] sm:$0xff]  ;;  %v907_v18 = vld [vmem:[%s1348_s28 + $0x48] sm:$0xff]  ;;  %s209_s4 = scalar_lea.vmem [#allocation7], %s929_s30  ;;  %s236_s20 = scalar_lea.vmem [#allocation8], %s901_s5 }
  0x63   : > { %290 = vmatprep.subr.mxu0 %v249_v4  ;;  %v429_v16 = vunpack.c.l.bf16 %v906_v7  ;;  %v246_v17 = vunpack.c.l.bf16 %v241_v8  ;;  %v426_v19 = vunpack.c.h.bf16 %v904_v12  ;;  %v914_v20 = vld [vmem:[%s1348_s28 + $0x50] sm:$0xff]  ;;  %v425_v21 = vunpack.c.l.bf16 %v904_v12  ;;  %v905_v22 = vld [vmem:[%s1348_s28 + $0x18] sm:$0xff]  ;;  %v912_v26 = vld [vmem:[%s1348_s28 + $0x20] sm:$0xff]  ;;  %s791_s6 = sshll.u32 %s236_s20, 4  ;;  %s789_s9 = scalar_lea.hbm %s1417_s3, %s921_s11  ;;  %s792_s6 = int_to_ptr.vmem [resolvable:$true] %s791_s6 }
  0x64   : > { %291 = vmatpush1.msra.mxu0 %v248_v5  ;;  %361 = vmatprep.subr.mxu1 %v251_v10  ;;  %v432_v23 = vunpack.c.h.bf16 %v907_v18  ;;  %v431_v24 = vunpack.c.l.bf16 %v907_v18  ;;  %v608_v25 = vunpack.c.h.bf16 %v914_v20  ;;  %v607_v27 = vunpack.c.l.bf16 %v914_v20  ;;  %v915_v30 = vld [vmem:[%s1348_s28 + $0x58] sm:$0xff]  ;;  %v913_v33 = vld [vmem:[%s1348_s28 + $0x28] sm:$0xff]  ;;  %v252_v38 = vld [vmem:[%s209_s4] sm:$0xff]  ;;  %s778_s7 = scalar_lea.sflag [#allocation4], %s1345_s25  ;;  %s1078_s17 = scalar_lea.vmem %s792_s6, 128 }
  0x65   : > { %292 = vmatprep.subr.mxu0 %v245_v6  ;;  %362 = vmatpush1.msra.mxu1 %v250_v11  ;;  %v428_v28 = vunpack.c.h.bf16 %v905_v22  ;;  %v427_v29 = vunpack.c.l.bf16 %v905_v22  ;;  %v604_v31 = vunpack.c.h.bf16 %v912_v26  ;;  %v603_v32 = vunpack.c.l.bf16 %v912_v26  ;;  %v908_v39 = vld [vmem:[%s209_s4 + $0x10] sm:$0xff]  ;;  %v253_v41 = vld [vmem:[%s209_s4 + $0x8] sm:$0xff]  ;;  %v909_v45 = vld [vmem:[%s209_s4 + $0x18] sm:$0xff]  ;;  %p1079_p2 = scmp.ne.s32.totalorder %s792_s6, %s1078_s17  ;;  %p1433_p3 = scmp.ne.s32.totalorder %s1424_s27, 0 }
  0x66   : > { %293 = vmatpush1.msra.mxu0 %v244_v9  ;;  %363 = vmatprep.subr.mxu1 %v247_v14  ;;  %v610_v34 = vunpack.c.h.bf16 %v915_v30  ;;  %v609_v35 = vunpack.c.l.bf16 %v915_v30  ;;  %v606_v36 = vunpack.c.h.bf16 %v913_v33  ;;  %v605_v37 = vunpack.c.l.bf16 %v913_v33  ;;  %v916_v50 = vld [vmem:[%s209_s4 + $0x20] sm:$0xff]  ;;  %v917_v1 = vld [vmem:[%s209_s4 + $0x28] sm:$0xff]  ;;  %s1155_s18 = smov [#allocation8]  }
  0x67   : > { %902 = vmatmul.mubr.msk.f32.vlgmr.msra.gmra.mxu0 %vm258_vm0, %v239_v15  ;;  %468 = vmatprep.subr.mxu0 %v430_v13  ;;  %v255_v40 = vunpack.c.h.bf16 %v252_v38  ;;  %v254_v42 = vunpack.c.l.bf16 %v252_v38  ;;  %v436_v43 = vunpack.c.l.bf16 %v908_v39  ;;  %v256_v44 = vunpack.c.l.bf16 %v253_v41  ;;  %p1080_p8 = pnand %p1079_p2, %p1433_p3  ;;  %s1082_s21 = sshll.u32 %s1155_s18, 4  ;;  %s1083_s21 = int_to_ptr.vmem [resolvable:$false] %s1082_s21 }
  0x68   : > { %469 = vmatpush1.msra.mxu0 %v429_v16  ;;  %364 = vmatpush1.msra.mxu1 %v246_v17  ;;  %v437_v47 = vunpack.c.h.bf16 %v908_v39  ;;  %v438_v52 = vunpack.c.l.bf16 %v909_v45  ;;  %v614_v58 = vunpack.c.l.bf16 %v916_v50  ;;  %v257_v61 = vunpack.c.h.bf16 %v253_v41  ;;  %s1084_s26 = scalar_lea.vmem %s1083_s21, 256  ;;  %p1085_p6 = scmp.lt.s32.totalorder %s792_s6, %s1083_s21 }
  0x69   : > { %470 = vmatprep.subr.mxu0 %v426_v19  ;;  %903 = vmatmul.mubr.msk.f32.vlgmr.msra.gmra.mxu1 %vm258_vm0, %v239_v15  ;;  %v405_v46 = vmul.f32 16.0, %v255_v40  ;;  %v404_v49 = vmul.f32 16.0, %v254_v42  ;;  %v582_v51 = vmul.f32 16.0, %v436_v43  ;;  %v406_v55 = vmul.f32 16.0, %v256_v44  ;;  %p1081_p1 = pneg %p1080_p8  ;;  %p1086_p0 = scmp.lt.s32.totalorder %s1084_s26, %s1078_s17 }
  0x6a   : > { %471 = vmatpush1.msra.mxu0 %v425_v21  ;;  %504 = vmatprep.mubr.f32.mxu0 %v1154_v0  ;;  %v583_v57 = vmul.f32 16.0, %v437_v47  ;;  %v439_v63 = vunpack.c.h.bf16 %v909_v45  ;;  %v584_v3 = vmul.f32 16.0, %v438_v52  ;;  %v760_v8 = vmul.f32 16.0, %v614_v58 }
  0x6b   : > { %539 = vmatprep.subr.mxu1 %v432_v23  ;;  %910 = vmatmul.mubr.msk.f32.vlgmr.msra.gmra.mxu0 %vm258_vm0, %v239_v15  ;;  %v616_v9 = vunpack.c.l.bf16 %v917_v1  ;;  %v407_v11 = vmul.f32 16.0, %v257_v61  ;;  %v617_v18 = vunpack.c.h.bf16 %v917_v1  ;;  %p1087_p4 = por %p1086_p0, %p1085_p6 }
  0x6c   : > { %540 = vmatpush1.msra.mxu1 %v431_v24  ;;  %646 = vmatprep.subr.mxu0 %v608_v25  ;;  %v585_v13 = vmul.f32 16.0, %v439_v63 }
  0x6d   : > { %541 = vmatprep.subr.mxu1 %v428_v28  ;;  %647 = vmatpush1.msra.mxu0 %v607_v27  ;;  %v762_v26 = vmul.f32 16.0, %v616_v9  ;;  %p1088_p10 = pnand %p1087_p4, %p1081_p1 }
  0x6e   : > { %542 = vmatpush1.msra.mxu1 %v427_v29  ;;  %575 = vmatprep.mubr.f32.mxu1 %v1154_v0 }
  0x6f   : > { %648 = vmatprep.subr.mxu0 %v604_v31  ;;  %911 = vmatmul.mubr.msk.f32.vlgmr.msra.gmra.mxu1 %vm258_vm0, %v239_v15 }
  0x70   : > { %649 = vmatpush1.msra.mxu0 %v603_v32  ;;  %682 = vmatprep.mubr.f32.mxu0 %v1154_v0  ;;  %v763_v32 = vmul.f32 16.0, %v617_v18 }
  0x71   : > { %717 = vmatprep.subr.mxu1 %v610_v34  ;;  %918 = vmatmul.mubr.msk.f32.vlgmr.msra.gmra.mxu0 %vm258_vm0, %v239_v15 }
  0x72   : > { %718 = vmatpush1.msra.mxu1 %v609_v35  ;;  %753 = vmatprep.mubr.f32.mxu1 %v1154_v0  ;;  %v615_v0 = vunpack.c.h.bf16 %v916_v50 }
  0x73   : > { %719 = vmatprep.subr.mxu1 %v606_v36 }
  0x74   : > { %720 = vmatpush1.msra.mxu1 %v605_v37  ;;  %v761_v14 = vmul.f32 16.0, %v615_v0 }
  0x75   : > { %919 = vmatmul.mubr.msk.f32.vlgmr.msra.gmra.mxu1 %vm258_vm0, %v239_v15 }
 0x127   : > { %v328_v48 = vpop.f32.mrf.mxu0 }
 0x128   : > { %v408_v59 = vsub.f32 %v328_v48, %v404_v49 }
 0x129   : > { %v330_v53 = vpop.f32.mrf.mxu0  ;;  %v399_v54 = vpop.f32.mrf.mxu1 }
 0x12a   : > { %v409_v56 = vsub.f32 %v330_v53, %v405_v46  ;;  %v410_v5 = vsub.f32 %v399_v54, %v406_v55  ;;  %v412_v10 = vmul.f32 %v408_v59, %v408_v59 }
 0x12b   : > { %v506_v60 = vpop.f32.mrf.mxu0  ;;  %v401_v62 = vpop.f32.mrf.mxu1 }
 0x12c   : > { %v586_v2 = vsub.f32 %v506_v60, %v582_v51  ;;  %v413_v4 = vmul.f32 %v409_v56, %v409_v56  ;;  %v414_v20 = vmul.f32 %v410_v5, %v410_v5  ;;  %v411_v27 = vsub.f32 %v401_v62, %v407_v11 }
 0x12d   : > { %v508_v6 = vpop.f32.mrf.mxu0 }
 0x12e   : > { %v587_v7 = vsub.f32 %v508_v6, %v583_v57  ;;  %v590_v15 = vmul.f32 %v586_v2, %v586_v2  ;;  %v416_v19 = vadd.f32 %v413_v4, %v412_v10  ;;  %v415_v39 = vmul.f32 %v411_v27, %v411_v27 }
 0x12f   : > { %v577_v12 = vpop.f32.mrf.mxu1 }
 0x130   : > { %v591_v16 = vmul.f32 %v587_v7, %v587_v7  ;;  %v588_v17 = vsub.f32 %v577_v12, %v584_v3  ;;  %v417_v33 = vadd.f32 %v416_v19, %v414_v20 }
 0x131   : > { %v684_v21 = vpop.f32.mrf.mxu0  ;;  %v579_v22 = vpop.f32.mrf.mxu1 }
 0x132   : > { %v594_v23 = vadd.f32 %v591_v16, %v590_v15  ;;  %v592_v24 = vmul.f32 %v588_v17, %v588_v17  ;;  %v764_v25 = vsub.f32 %v684_v21, %v760_v8  ;;  %v589_v28 = vsub.f32 %v579_v22, %v585_v13 }
 0x133   : > { %v686_v29 = vpop.f32.mrf.mxu0  ;;  %v418_v45 = vadd.f32 %v417_v33, %v415_v39 }
 0x134   : > { %v595_v30 = vadd.f32 %v594_v23, %v592_v24  ;;  %v765_v31 = vsub.f32 %v686_v29, %v761_v14  ;;  %v768_v35 = vmul.f32 %v764_v25, %v764_v25  ;;  %v593_v36 = vmul.f32 %v589_v28, %v589_v28 }
 0x135   : > { %v755_v34 = vpop.f32.mrf.mxu1 }
 0x136   : > { %v769_v37 = vmul.f32 %v765_v31, %v765_v31  ;;  %v766_v38 = vsub.f32 %v755_v34, %v762_v26  ;;  %v596_v41 = vadd.f32 %v595_v30, %v593_v36 }
 0x137   : > { %v757_v40 = vpop.f32.mrf.mxu1 }
 0x138   : > { %v772_v42 = vadd.f32 %v769_v37, %v768_v35  ;;  %v770_v43 = vmul.f32 %v766_v38, %v766_v38  ;;  %v767_v44 = vsub.f32 %v757_v40, %v763_v32  ;;  %v597_v48 = vadd.f32 %v596_v41, %v418_v45 }
 0x13a   : > { %v773_v46 = vadd.f32 %v772_v42, %v770_v43  ;;  %v771_v47 = vmul.f32 %v767_v44, %v767_v44 }
 0x13c   : > { %v774_v49 = vadd.f32 %v773_v46, %v771_v47 }
 0x13e   : > { %v775_v50 = vadd.f32 %v774_v49, %v597_v48 }
 0x140   : > { %776 = vst [vmem:[%s236_s20] sm:$0xff] %v775_v50 }
 0x141   : > { %1091 = shalt.err (!%p1088_p10)
}
 0x142   : > { %s1092_s22 = scalar_lea.hbm %s789_s9, 128  ;;  %s1096_s24 = scalar_lea.hbm %s1417_s3, 512 }
 0x143   : > { %p1093_p9 = scmp.ne.s32.totalorder %s789_s9, %s1092_s22  ;;  %p1097_p13 = scmp.lt.s32.totalorder %s789_s9, %s1417_s3 }
 0x144   : > { %p1098_p11 = scmp.lt.s32.totalorder %s1096_s24, %s1092_s22 }
 0x145   : > { %p1094_p12 = pnand %p1093_p9, %p1433_p3 }
 0x146   : > { %p1099_p5 = por %p1098_p11, %p1097_p13 }
 0x147   : > { %p1095_p7 = pneg %p1094_p12 }
 0x149   : > { %p1100_p2 = pnand %p1099_p5, %p1095_p7 }
 0x14b   : > { %1103 = shalt.err (!%p1100_p2)
}
 0x14c   : > { %938 = dma.vmem_to_hbm [thread:$0]  (%p1433_p3), %s792_s6, 128, %s789_s9, %s778_s7  }
 0x14d PF: > { %p958_p8 = scmp.ge.s32.totalorder %s1146_s15, 2  ;;  %s803_s4 = sand.u32 1, %s1134_s12  }
 0x14e   : > { %p1434_p1 = scmp.ne.s32.totalorder %s1425_s29, 0  ;;  %s804_s5 = scalar_lea.sflag [#allocation4], %s803_s4 }
 0x150   : > { %p952_p6 = pnand %p958_p8, %p1434_p1 }
 0x152   : > { %p953_p0 = pneg %p952_p6 }
 0x154   : > { %1129 = dma.done.wait (%p953_p0), %s804_s5, 128  }
 0x155   : > { %1131 = vsyncadd (%p953_p0), %s804_s5, 4294967168  ;;  %p17_p4 = scmp.ge.s32.totalorder %s1197_s16, 6   ;;  %s1435_s12 = smov %s1138_s13 }
 0x156   : > { %s1436_s13 = smov %s1142_s14  ;;  %s1437_s14 = smov %s1207_s19 }
 0x157   : > { %s1438_s15 = smov %s1197_s16  ;;  %19 = sbr.rel (!%p17_p4) target bundleno = 6 (0x6), region = 97 }
 0x15c   :  { %809 = vsyncpa [#allocation3], 1 }
 0x15d   :  { %811 = vsyncpa [#allocation3 + $0x1], 1 }
 0x15e   :  { %812 = vsyncpa [#allocation6], 1 }
 0x15f   :  { %814 = vsyncpa [#allocation6 + $0x1], 1 }
 0x160   :  { %815 = vsyncpa [#allocation4], 1 }
 0x161   :  { %817 = vsyncpa [#allocation4 + $0x1], 1 }

</bundles_post_ra>
